<compile_context>
chip_gen: v7x
topology: tpu7x:2x2x1
jax: 0.10.0
libtpu: 0.0.40
codegen_flags: <defaults>
</compile_context>

<pallas_src>
import functools

import jax
import jax.numpy as jnp
from jax.experimental import pallas as pl
from jax.experimental.pallas import tpu as pltpu


# ----------------------------------------------------------------------------
# Interpolation-weight construction (glue, plain JAX).
# ----------------------------------------------------------------------------
def _interp_weight_matrix(out_size, in_size, mode, align_corners):
    """W of shape (out_size, in_size) s.t. y = W @ x resamples a length-in_size
    signal to length out_size with F.interpolate semantics."""
    out_size = int(out_size)
    in_size = int(in_size)
    dst = jnp.arange(out_size, dtype=jnp.float32)

    if mode == "nearest":
        # PyTorch legacy 'nearest': src = floor(dst * in/out)
        src = jnp.floor(dst * (in_size / out_size)).astype(jnp.int32)
        src = jnp.clip(src, 0, in_size - 1)
        return jax.nn.one_hot(src, in_size, dtype=jnp.float32)

    if mode in ("bilinear", "linear"):
        if align_corners:
            if out_size == 1:
                src = jnp.zeros((out_size,), jnp.float32)
            else:
                src = dst * ((in_size - 1) / (out_size - 1))
        else:
            src = (dst + 0.5) * (in_size / out_size) - 0.5
        src = jnp.clip(src, 0.0, float(in_size - 1))
        lo = jnp.floor(src).astype(jnp.int32)
        hi = jnp.minimum(lo + 1, in_size - 1)
        w_hi = src - lo.astype(jnp.float32)
        w_lo = 1.0 - w_hi
        W = (jax.nn.one_hot(lo, in_size, dtype=jnp.float32) * w_lo[:, None]
             + jax.nn.one_hot(hi, in_size, dtype=jnp.float32) * w_hi[:, None])
        return W

    raise NotImplementedError(f"mode={mode!r} not supported")


# ----------------------------------------------------------------------------
# VMEM limit: query the chip, fall back to a known-safe default.
# ----------------------------------------------------------------------------
def _vmem_limit_bytes():
    try:
        cap = int(pltpu.get_tpu_info().vmem_capacity_bytes)
    except Exception:
        return 32 * 1024 * 1024                       # known-safe default
    # v5e/v6e (128 MiB) -> 64 MiB; v7x (64 MiB) -> 48 MiB.
    return max(32 * 1024 * 1024, min(64 * 1024 * 1024, (cap * 3) // 4))


# ----------------------------------------------------------------------------
# Static tile selection (host side).
#   TC  = channels per grid step (DMA block size).
#   GRP = channels per block-diagonal H-pass group (MXU K ~ 256).
# ----------------------------------------------------------------------------
def _pick_tiles(nc, h_in, w_in, h_out, w_out, x_isz, w_isz, fuse_w, group_h):
    out_ch = h_out * w_out * x_isz
    in_ch = h_in * w_in * x_isz
    tmp_ch = (h_in * w_out + h_out * w_out) * 4        # f32 intermediates
    per_ch = 2 * (out_ch + in_ch) + tmp_ch             # double-buffered I/O
    budget = 20 * 1024 * 1024                          # block budget, all gens
    target = 1 * 1024 * 1024                           # ~1 MiB out / grid step

    # --- group size: fill the MXU K dimension (~256) with GRP*H_in rows ---
    grp = 1
    if fuse_w:
        grp = max(1, min(256 // max(h_in, 1), nc))
        if group_h:
            # cap the block-diagonal weight matrix at ~2 MiB
            while grp > 1 and (grp * h_out) * (grp * h_in) * w_isz > 2 * 1024 * 1024:
                grp -= 1

    # --- channels per grid step ---
    tc = min(target // max(out_ch, 1), budget // max(per_ch, 1))
    cap = min(64, 8 * grp) if fuse_w else 32            # bound static unroll
    tc = max(1, min(int(tc), nc, cap))
    if tc >= nc and nc >= 2:                            # keep >= 2 grid steps
        tc = -(-nc // 2)
    if fuse_w:
        grp = min(grp, tc)
        while tc % grp:                                  # GRP must divide TC
            grp -= 1

    # --- prefer an even number of grid steps (v7x dual TensorCore) ---
    steps = -(-nc // tc)
    if steps > 1 and steps % 2:
        tc2 = -(-nc // (steps + 1))
        if fuse_w:
            tc2 = max(grp, -(-tc2 // grp) * grp)
        if 1 <= tc2 <= tc and (-(-nc // tc2)) % 2 == 0:
            tc = tc2
    return tc, grp


# ----------------------------------------------------------------------------
# Pallas kernel: a batch of TC (n,c) slices per grid step, processed in
# groups of GRP channels.
#   W-pass : (GRP*H_in, W_in) @ (W_in, W_out)              -> one MXU matmul
#   H-pass : blockdiag(Wh) (GRP*H_out, GRP*H_in) @ t        -> one MXU matmul
# ----------------------------------------------------------------------------
def _upsample_kernel(wh_ref, wwt_ref, x_ref, o_ref, *,
                     grp, h_in, h_out, fuse_w, group_h):
    wwt = wwt_ref[...]                  # (W_in, W_out)  -- pre-transposed
    n_ch, _, w_in = x_ref.shape
    wh = wh_ref[...]                    # blockdiag (GRP*H_out, GRP*H_in) if
                                        # group_h else (H_out, H_in)

    if fuse_w:
        for gi in range(n_ch // grp):
            base = gi * grp
            # Free relayout: H_in is sublane-pack aligned (guarded on host).
            xg = x_ref[pl.ds(base, grp), :, :].reshape(grp * h_in, w_in)
            t = jnp.dot(xg, wwt, preferred_element_type=jnp.float32)
            t = t.astype(wh.dtype)      # per-chunk cast (free filler)
            if group_h:
                # Single big-K matmul for the whole group.
                y = jnp.dot(wh, t, preferred_element_type=jnp.float32)
                for c in range(grp):
                    o_ref[base + c] = (
                        y[c * h_out:(c + 1) * h_out, :].astype(o_ref.dtype))
            else:
                # H_out not aligned: per-channel H-pass with plain Wh.
                for c in range(grp):
                    o_ref[base + c] = jnp.dot(
                        wh, t[c * h_in:(c + 1) * h_in, :],
                        preferred_element_type=jnp.float32).astype(o_ref.dtype)
    else:
        # Fully per-channel fallback (H_in not sublane-pack aligned).
        for c in range(n_ch):
            t = jnp.dot(x_ref[c], wwt,
                        preferred_element_type=jnp.float32).astype(wh.dtype)
            o_ref[c] = jnp.dot(wh, t,
                               preferred_element_type=jnp.float32
                               ).astype(o_ref.dtype)


@functools.partial(jax.jit, static_argnames=("size", "mode", "align_corners"))
def pallas_interpolate(x, size, mode="nearest", align_corners=None):
    """x: (N, C, H_in, W_in) -> (N, C, H_out, W_out), F.interpolate semantics."""
    N, C, H_in, W_in = x.shape
    H_out, W_out = int(size[0]), int(size[1])

    # bf16 inputs -> bf16 weights for native MXU throughput (f32 accumulate);
    # f32 inputs keep exact f32 weights.
    w_dtype = jnp.bfloat16 if x.dtype == jnp.bfloat16 else jnp.float32
    wh = _interp_weight_matrix(H_out, H_in, mode, align_corners).astype(w_dtype)
    ww_t = _interp_weight_matrix(W_out, W_in, mode,
                                 align_corners).T.astype(w_dtype)  # (W_in, W_out)

    # Dtype-aware sublane packing: 8 (f32) / 16 (bf16) / 32 (int8).
    pack = max(8, 32 // x.dtype.itemsize)
    fuse_w = (H_in % pack == 0)
    group_h = fuse_w and (H_out % pack == 0)

    NC = N * C
    TC, GRP = _pick_tiles(NC, H_in, W_in, H_out, W_out,
                          x.dtype.itemsize, jnp.dtype(w_dtype).itemsize,
                          fuse_w, group_h)

    # Block-diagonal Wh for the grouped H-pass.
    if group_h and GRP > 1:
        wh_arg = jnp.kron(jnp.eye(GRP, dtype=w_dtype), wh)
    else:
        wh_arg = wh

    G = -(-NC // TC)
    NC_pad = G * TC

    x_flat = x.reshape(NC, H_in, W_in)
    if NC_pad != NC:
        x_flat = jnp.pad(x_flat, ((0, NC_pad - NC), (0, 0), (0, 0)))

    kernel = functools.partial(_upsample_kernel, grp=GRP, h_in=H_in,
                               h_out=H_out, fuse_w=fuse_w, group_h=group_h)

    cost = pl.CostEstimate(
        flops=2 * NC * W_out * (H_in * W_in + H_out * H_in),
        transcendentals=0,
        bytes_accessed=(x.size * x.dtype.itemsize
                        + NC * H_out * W_out * x.dtype.itemsize
                        + wh_arg.size * wh_arg.dtype.itemsize
                        + ww_t.size * ww_t.dtype.itemsize),
    )

    out_flat = pl.pallas_call(
        kernel,
        out_shape=jax.ShapeDtypeStruct((NC_pad, H_out, W_out), x.dtype),
        grid_spec=pltpu.PrefetchScalarGridSpec(
            num_scalar_prefetch=0,
            grid=(G,),
            in_specs=[
                pl.BlockSpec(wh_arg.shape, lambda i: (0, 0)),
                pl.BlockSpec((W_in, W_out), lambda i: (0, 0)),
                pl.BlockSpec((TC, H_in, W_in), lambda i: (i, 0, 0)),
            ],
            out_specs=pl.BlockSpec((TC, H_out, W_out), lambda i: (i, 0, 0)),
        ),
        compiler_params=pltpu.CompilerParams(
            dimension_semantics=("parallel",),
            vmem_limit_bytes=_vmem_limit_bytes(),
        ),
        cost_estimate=cost,
    )(wh_arg, ww_t, x_flat)

    if NC_pad != NC:
        out_flat = out_flat[:NC]
    return out_flat.reshape(N, C, H_out, W_out)


# ----------------------------------------------------------------------------
# Module-equivalent wrapper (mirrors mmseg.ops.wrappers.Upsample.forward).
# ----------------------------------------------------------------------------
class Upsample:
    def __init__(self, size=None, scale_factor=None, mode="nearest",
                 align_corners=None):
        self.size = size
        if isinstance(scale_factor, tuple):
            self.scale_factor = tuple(float(f) for f in scale_factor)
        else:
            self.scale_factor = float(scale_factor) if scale_factor else None
        self.mode = mode
        self.align_corners = align_corners

    def __call__(self, x):
        if not self.size:
            if isinstance(self.scale_factor, tuple):
                sf_h, sf_w = self.scale_factor
            else:
                sf_h = sf_w = self.scale_factor
            size = (int(x.shape[-2] * sf_h), int(x.shape[-1] * sf_w))
        else:
            size = tuple(int(s) for s in self.size)
        return pallas_interpolate(x, size, self.mode, self.align_corners)


# ----------------------------------------------------------------------------
if __name__ == "__main__":
    key = jax.random.PRNGKey(0)
    N, C, H, W = 2, 4, 16, 16
    x = jax.random.normal(key, (N, C, H, W), dtype=jnp.float32)

    # --- case 1: default module config (mode='nearest', scale_factor=2) ---
    up_nearest = Upsample(scale_factor=2, mode="nearest")
    y_nearest = jax.block_until_ready(up_nearest(x))
    assert y_nearest.shape == (N, C, 2 * H, 2 * W)
    idx_h = jnp.floor(jnp.arange(2 * H) * (H / (2 * H))).astype(jnp.int32)
    idx_w = jnp.floor(jnp.arange(2 * W) * (W / (2 * W))).astype(jnp.int32)
    ref_nearest = x[:, :, idx_h, :][:, :, :, idx_w]
    assert jnp.allclose(y_nearest, ref_nearest, atol=0, rtol=0)

    # --- case 2: bilinear, align_corners=False, explicit size ---
    up_bilinear = Upsample(size=(24, 40), mode="bilinear", align_corners=False)
    y_bilinear = jax.block_until_ready(up_bilinear(x))
    assert y_bilinear.shape == (N, C, 24, 40)
    wh = _interp_weight_matrix(24, H, "bilinear", False)
    ww = _interp_weight_matrix(40, W, "bilinear", False)
    ref_bilinear = jnp.einsum("oh,nchw,pw->ncop", wh, x, ww)
    assert jnp.allclose(y_bilinear, ref_bilinear, atol=1e-5, rtol=1e-5)

    # --- case 3: bilinear, align_corners=True, odd output size ---
    up_ac = Upsample(size=(33, 33), mode="bilinear", align_corners=True)
    y_ac = jax.block_until_ready(up_ac(x))
    assert y_ac.shape == (N, C, 33, 33)
    wh_ac = _interp_weight_matrix(33, H, "bilinear", True)
    ww_ac = _interp_weight_matrix(33, W, "bilinear", True)
    ref_ac = jnp.einsum("oh,nchw,pw->ncop", wh_ac, x, ww_ac)
    assert jnp.allclose(y_ac, ref_ac, atol=1e-5, rtol=1e-5)

    print("KERNEL_OK")
</pallas_src>

<mosaic_0001>
module attributes {stable_mosaic.version = 11 : i64} {
  func.func @_upsample_kernel(%arg0: i32, %arg1: memref<128x64xf32, #tpu.memory_space<vmem>>, %arg2: memref<16x32xf32, #tpu.memory_space<vmem>>, %arg3: memref<4x16x16xf32, #tpu.memory_space<vmem>>, %arg4: memref<4x32x32xf32, #tpu.memory_space<vmem>>) attributes {dimension_semantics = [#tpu.dimension_semantics<parallel>], iteration_bounds = array<i64: 2>, scalar_prefetch = 0 : i64, scratch_operands = 0 : i64, tpu.core_type = #tpu.core_type<tc>, window_params = [{pipeline_mode = #tpu.pipeline_mode<synchronous>, transform_indices = @transform_0, window_bounds = array<i64: 128, 64>}, {pipeline_mode = #tpu.pipeline_mode<synchronous>, transform_indices = @transform_1, window_bounds = array<i64: 16, 32>}, {transform_indices = @transform_2, window_bounds = array<i64: 4, 16, 16>}, {transform_indices = @transform_3, window_bounds = array<i64: 4, 32, 32>}]} {
    %c0 = arith.constant 0 : index
    %c0_0 = arith.constant 0 : index
    %0 = vector.load %arg2[%c0, %c0_0] : memref<16x32xf32, #tpu.memory_space<vmem>>, vector<16x32xf32>
    %c0_1 = arith.constant 0 : index
    %c0_2 = arith.constant 0 : index
    %1 = vector.load %arg1[%c0_1, %c0_2] : memref<128x64xf32, #tpu.memory_space<vmem>>, vector<128x64xf32>
    %c0_3 = arith.constant 0 : index
    %c0_4 = arith.constant 0 : index
    %c0_5 = arith.constant 0 : index
    %2 = vector.load %arg3[%c0_3, %c0_4, %c0_5] : memref<4x16x16xf32, #tpu.memory_space<vmem>>, vector<4x16x16xf32>
    %3 = vector.shape_cast %2 : vector<4x16x16xf32> to vector<64x16xf32>
    %cst = arith.constant dense<0.000000e+00> : vector<64x32xf32>
    %4 = tpu.matmul %3, %0, %cst {dimension_numbers = #tpu.dot_dimension_numbers<[1], [0], [0], [1], [0, 0, 1, 1], [], []>} : vector<64x16xf32>, vector<16x32xf32>, vector<64x32xf32> -> vector<64x32xf32>
    %cst_6 = arith.constant dense<0.000000e+00> : vector<128x32xf32>
    %5 = tpu.matmul %1, %4, %cst_6 {dimension_numbers = #tpu.dot_dimension_numbers<[1], [0], [0], [1], [0, 0, 1, 1], [], []>} : vector<128x64xf32>, vector<64x32xf32>, vector<128x32xf32> -> vector<128x32xf32>
    %6 = vector.extract_strided_slice %5 {offsets = [0, 0], sizes = [32, 32], strides = [1, 1]} : vector<128x32xf32> to vector<32x32xf32>
    %c0_7 = arith.constant 0 : index
    %c0_8 = arith.constant 0 : index
    %c0_9 = arith.constant 0 : index
    %7 = vector.load %arg4[%c0_7, %c0_8, %c0_9] : memref<4x32x32xf32, #tpu.memory_space<vmem>>, vector<1x32x32xf32>
    %8 = vector.shape_cast %7 : vector<1x32x32xf32> to vector<32x32xf32>
    %9 = vector.shape_cast %6 : vector<32x32xf32> to vector<1x32x32xf32>
    tpu.vector_store %arg4[%c0_7, %c0_8, %c0_9], %9 {strides = array<i32>} : memref<4x32x32xf32, #tpu.memory_space<vmem>>, vector<1x32x32xf32>,
    %10 = vector.extract_strided_slice %5 {offsets = [32, 0], sizes = [32, 32], strides = [1, 1]} : vector<128x32xf32> to vector<32x32xf32>
    %c1 = arith.constant 1 : index
    %c0_10 = arith.constant 0 : index
    %c0_11 = arith.constant 0 : index
    %11 = vector.load %arg4[%c1, %c0_10, %c0_11] : memref<4x32x32xf32, #tpu.memory_space<vmem>>, vector<1x32x32xf32>
    %12 = vector.shape_cast %11 : vector<1x32x32xf32> to vector<32x32xf32>
    %13 = vector.shape_cast %10 : vector<32x32xf32> to vector<1x32x32xf32>
    tpu.vector_store %arg4[%c1, %c0_10, %c0_11], %13 {strides = array<i32>} : memref<4x32x32xf32, #tpu.memory_space<vmem>>, vector<1x32x32xf32>,
    %14 = vector.extract_strided_slice %5 {offsets = [64, 0], sizes = [32, 32], strides = [1, 1]} : vector<128x32xf32> to vector<32x32xf32>
    %c2 = arith.constant 2 : index
    %c0_12 = arith.constant 0 : index
    %c0_13 = arith.constant 0 : index
    %15 = vector.load %arg4[%c2, %c0_12, %c0_13] : memref<4x32x32xf32, #tpu.memory_space<vmem>>, vector<1x32x32xf32>
    %16 = vector.shape_cast %15 : vector<1x32x32xf32> to vector<32x32xf32>
    %17 = vector.shape_cast %14 : vector<32x32xf32> to vector<1x32x32xf32>
    tpu.vector_store %arg4[%c2, %c0_12, %c0_13], %17 {strides = array<i32>} : memref<4x32x32xf32, #tpu.memory_space<vmem>>, vector<1x32x32xf32>,
    %18 = vector.extract_strided_slice %5 {offsets = [96, 0], sizes = [32, 32], strides = [1, 1]} : vector<128x32xf32> to vector<32x32xf32>
    %c3 = arith.constant 3 : index
    %c0_14 = arith.constant 0 : index
    %c0_15 = arith.constant 0 : index
    %19 = vector.load %arg4[%c3, %c0_14, %c0_15] : memref<4x32x32xf32, #tpu.memory_space<vmem>>, vector<1x32x32xf32>
    %20 = vector.shape_cast %19 : vector<1x32x32xf32> to vector<32x32xf32>
    %21 = vector.shape_cast %18 : vector<32x32xf32> to vector<1x32x32xf32>
    tpu.vector_store %arg4[%c3, %c0_14, %c0_15], %21 {strides = array<i32>} : memref<4x32x32xf32, #tpu.memory_space<vmem>>, vector<1x32x32xf32>,
    return
  }
  func.func @transform_0(%arg0: i32) -> (i32, i32) {
    %c0_i32 = arith.constant 0 : i32
    %c0_i32_0 = arith.constant 0 : i32
    %c0_i32_1 = arith.constant 0 : i32
    return %c0_i32, %c0_i32_0 : i32, i32
  }
  func.func @transform_1(%arg0: i32) -> (i32, i32) {
    %c0_i32 = arith.constant 0 : i32
    %c0_i32_0 = arith.constant 0 : i32
    %c0_i32_1 = arith.constant 0 : i32
    return %c0_i32, %c0_i32_0 : i32, i32
  }
  func.func @transform_2(%arg0: i32) -> (i32, i32, i32) {
    %c0_i32 = arith.constant 0 : i32
    %c0_i32_0 = arith.constant 0 : i32
    %c0_i32_1 = arith.constant 0 : i32
    return %arg0, %c0_i32, %c0_i32_0 : i32, i32, i32
  }
  func.func @transform_3(%arg0: i32) -> (i32, i32, i32) {
    %c0_i32 = arith.constant 0 : i32
    %c0_i32_0 = arith.constant 0 : i32
    %c0_i32_1 = arith.constant 0 : i32
    return %arg0, %c0_i32, %c0_i32_0 : i32, i32, i32
  }
}

</mosaic_0001>

<bundles_post_ra>
// kernel: pallas_interpolate.1
= control target key start
LH: loop header
LB: loop body
LE: loop exit
PB: predicated region body
PF: predicated region fallthrough
CT: control target
= control target key end

     0   :  { %8 = vsyncpa [#allocation3], 0  ;;  %s1140_s0 = inlined_call_operand.vmem [shape: f32[128,64], index: 0, kind: input, shape index: {}]   ;;  %s1141_s1 = inlined_call_operand.vmem [shape: f32[16,32], index: 1, kind: input, shape index: {}]   ;;  %s1142_s2 = inlined_call_operand.vmem [shape: f32[8,16,16], index: 2, kind: input, shape index: {}]   ;;  %s1143_s3 = inlined_call_operand.hbm [shape: f32[8,32,32], index: 3, kind: output, shape index: {}]  }
   0x1   :  { %10 = vsyncpa [#allocation3 + $0x1], 0  ;;  %s921_s12 = smov 0   ;;  %s923_s13 = smov 0  }
   0x2   :  { %s925_s14 = smov 0   ;;  %s927_s15 = smov 0  }
   0x3 LB: > { %s942_s16 = sadd.s32 4294967295, %s896_s15   ;;  %s622_s17 = sadd.s32 4294967294, %s896_s15   ;;  %s896_s15 = sphi %s927_s15, %s1149_s15   ;;  %s892_s14 = sphi %s925_s14, %s1148_s14   ;;  %s888_s13 = sphi %s923_s13, %s1147_s13   ;;  %s884_s12 = sphi %s921_s12, %s1146_s12  }
   0x4   : > { %s946_s18 = sadd.s32 1, %s896_s15   ;;  %s91_s19 = sadd.s32 1, %s892_s14 }
   0x5   : > { %s88_s20 = ssub.s32 %s896_s15, %s946_s18  ;;  %p101_p0 = scmp.ne.s32.totalorder %s892_s14, %s888_s13 }
   0x6   : > { %p89_p1 = scmp.eq.s32.totalorder %s88_s20, 0  ;;  %p102_p2 = scmp.eq.s32.totalorder %s942_s16, 1 }
   0x7   : > { %p107_p3 = scmp.ne.s32.totalorder %s888_s13, %s884_s12  ;;  %p108_p4 = scmp.eq.s32.totalorder %s622_s17, 1 }
   0x8   : > { %s957_s21 = scalar_select %p89_p1, %s892_s14, %s91_s19  }
   0x9   : > { %p959_p5 = por %p102_p2, %p101_p0  ;;  %p963_p6 = por %p108_p4, %p107_p3 }
   0xa   : > { %p625_p7 = scmp.ge.s32.totalorder %s896_s15, 1  ;;  %p142_p8 = scmp.lt.s32.totalorder %s896_s15, 3 }
   0xc   : > { %p143_p9 = pnand %p625_p7, %p142_p8 }
   0xd   : > { %v175_v0 = vld [vmem:[%s1141_s1] sm:$0xff] (!%p143_p9)  ;;  %v176_v1 = vld [vmem:[%s1141_s1 + $0x8] sm:$0xff] (!%p143_p9)  ;;  %s627_s28 = sshll.u32 (!%p143_p9), %s942_s16, 2  ;;  %vm201_vm0 = vcmask (!%p143_p9), 130048   ;;  %v183_v11 = vld [vmem:[%s1140_s0 + $0x30] sm:$0xff] (!%p143_p9)  ;;  %vm331_vm1 = vcmask (!%p143_p9), 523264  }
   0xe   : > { %146 = sbr.rel (%p143_p9) target bundleno = 501 (0x1f5), region = 32  ;;  %v765_v2 = vpack.c.bf16 (!%p143_p9), %v176_v1, %v175_v0  ;;  %p168_p10 = scmp.lt.s32.totalorder (!%p143_p9), %s627_s28, 7  ;;  %750 = vmatprep.mubr.msk.f32.mxu1 (!%p143_p9), %vm331_vm1, %v183_v11  ;;  %v177_v12 = vld [vmem:[%s1140_s0] sm:$0xff] (!%p143_p9)  ;;  %v184_v25 = vld [vmem:[%s1140_s0 + $0x38] sm:$0xff] (!%p143_p9)  ;;  %v178_v26 = vld [vmem:[%s1140_s0 + $0x8] sm:$0xff] (!%p143_p9)  ;;  %vm525_vm2 = vcmask (!%p143_p9), 261120  }
   0xf   : > { %v185_v27 = vld [vmem:[%s1140_s0 + $0x40] sm:$0xff] (!%p143_p9)  ;;  %v179_v28 = vld [vmem:[%s1140_s0 + $0x10] sm:$0xff] (!%p143_p9)  ;;  %v186_v29 = vld [vmem:[%s1140_s0 + $0x48] sm:$0xff] (!%p143_p9)  ;;  %s898_s11 = smov (!%p143_p9), [#allocation2]  }
  0x10   : > { %766 = vmatprep.subr.bf16.mxu0 (!%p143_p9), %v765_v2  ;;  %v180_v30 = vld [vmem:[%s1140_s0 + $0x18] sm:$0xff] (!%p143_p9)  ;;  %v187_v31 = vld [vmem:[%s1140_s0 + $0x50] sm:$0xff] (!%p143_p9)  ;;  %v181_v32 = vld [vmem:[%s1140_s0 + $0x20] sm:$0xff] (!%p143_p9)  ;;  %s838_s17 = sshll.u32 (!%p143_p9), %s898_s11, 4  ;;  %s839_s17 = int_to_ptr.vmem [resolvable:$false] %s838_s17 }
  0x11   : > { %768 = vmatpush3.bf16.msra.mxu0 (!%p143_p9), %v765_v2  ;;  %v188_v33 = vld [vmem:[%s1140_s0 + $0x58] sm:$0xff] (!%p143_p9)  ;;  %v182_v34 = vld [vmem:[%s1140_s0 + $0x28] sm:$0xff] (!%p143_p9)  ;;  %v189_v35 = vld [vmem:[%s1140_s0 + $0x60] sm:$0xff] (!%p143_p9)  ;;  %s840_s19 = scalar_lea.vmem (!%p143_p9), %s839_s17, 4096 }
  0x12   : > { %v190_v36 = vld [vmem:[%s1140_s0 + $0x68] sm:$0xff] (!%p143_p9)  ;;  %v191_v37 = vld [vmem:[%s1140_s0 + $0x70] sm:$0xff] (!%p143_p9)  ;;  %v192_v38 = vld [vmem:[%s1140_s0 + $0x78] sm:$0xff] (!%p143_p9) }
  0x15   : > { %s1151_s28 = smov (!%p168_p10, %s627_s28), 7 }
  0x16   : > { %s672_s29 = sshll.u32 %s1151_s28, 4 }
  0x17   : > { %s172_s5 = scalar_lea.vmem %s1142_s2, %s672_s29  ;;  %s164_s29 = sand.u32 1, %s888_s13  }
  0x18   : > { %v193_v3 = vld [vmem:[%s172_s5] sm:$0xff]  ;;  %v194_v4 = vld [vmem:[%s172_s5 + $0x8] sm:$0xff]  ;;  %v195_v5 = vld [vmem:[%s172_s5 + $0x10] sm:$0xff]  ;;  %s626_s30 = sshll.u32 %s164_s29, 7 }
  0x19   : > { %713 = vmatprep.mubr.msk.f32.mxu0 %vm201_vm0, %v193_v3  ;;  %v196_v6 = vld [vmem:[%s172_s5 + $0x18] sm:$0xff]  ;;  %v197_v7 = vld [vmem:[%s172_s5 + $0x20] sm:$0xff]  ;;  %v198_v8 = vld [vmem:[%s172_s5 + $0x28] sm:$0xff]  ;;  %s1054_s4 = scalar_lea.vmem [#allocation2], %s626_s30 }
  0x1a   : > { %714 = vmatmul.mubr.msk.f32.vlgmr.msra.gmra.mrb[0].mxu0 %vm201_vm0, %v194_v4  ;;  %v199_v9 = vld [vmem:[%s172_s5 + $0x30] sm:$0xff]  ;;  %v200_v10 = vld [vmem:[%s172_s5 + $0x38] sm:$0xff]  ;;  %s674_s5 = sshll.u32 %s942_s16, 11  ;;  %s560_s6 = sshll.u32 %s1054_s4, 4  ;;  %s1091_s6 = int_to_ptr.vmem [resolvable:$true] %s560_s6 }
  0x1b   : > { %716 = vmatprep.mubr.msk.f32.mxu0 %vm201_vm0, %v195_v5  ;;  %s1089_s9 = scalar_lea.hbm %s1143_s3, %s674_s5  ;;  %s1099_s16 = scalar_lea.sflag [#allocation3], %s164_s29 }
  0x1c   : > { %s834_s10 = scalar_lea.vmem %s1091_s6, 2048  ;;  %p841_p0 = scmp.lt.s32.totalorder %s1091_s6, %s839_s17 }
  0x1d   : > { %p835_p11 = scmp.ne.s32.totalorder %s1091_s6, %s834_s10  ;;  %p842_p1 = scmp.lt.s32.totalorder %s840_s19, %s834_s10 }
  0x1e   : > { %717 = vmatmul.mubr.msk.f32.gmra.mrb[2].mxu0 %vm201_vm0, %v196_v6 }
  0x1f   : > { %719 = vmatprep.mubr.msk.f32.mxu0 %vm201_vm0, %v197_v7  ;;  %p836_p12 = pnand %p835_p11, %p959_p5  ;;  %p843_p2 = por %p842_p1, %p841_p0 }
  0x21   : > { %p837_p13 = pneg %p836_p12 }
  0x22   : > { %720 = vmatmul.mubr.msk.f32.gmra.mrb[4].mxu0 %vm201_vm0, %v198_v8 }
  0x23   : > { %722 = vmatprep.mubr.msk.f32.mxu0 %vm201_vm0, %v199_v9  ;;  %p844_p3 = pnand %p843_p2, %p837_p13 }
  0x26   : > { %723 = vmatmul.mubr.msk.f32.gmra.mrb[6].mxu0 %vm201_vm0, %v200_v10 }
  0x27   : > { %741 = vmatprep.mubr.msk.f32.mxu0 %vm331_vm1, %v177_v12 }
  0xed   : > { %v715_v13 = vpop.f32.mrb[0].mxu0 }
  0xee   : > { %v292_v14 = vpop.f32.mrb[1].mxu0 }
  0xef   : > { %v769_v15 = vpack.c.bf16 %v715_v13, %v292_v14 }
  0xf1   : > { %v718_v16 = vpop.f32.mrb[2].mxu0  ;;  %770 = vmatprep.subr.bf16.mxu0 %v769_v15  ;;  %785 = vmatprep.subr.bf16.mxu1 %v769_v15 }
  0xf2   : > { %v302_v17 = vpop.f32.mrb[3].mxu0  ;;  %772 = vmatpush3.bf16.msra.mxu0 %v769_v15  ;;  %789 = vmatpush3.bf16.msra.mxu1 %v769_v15 }
  0xf3   : > { %v773_v18 = vpack.c.bf16 %v718_v16, %v302_v17 }
  0xf5   : > { %v721_v19 = vpop.f32.mrb[4].mxu0  ;;  %774 = vmatprep.subr.bf16.mxu0 %v773_v18  ;;  %786 = vmatprep.subr.bf16.mxu1 %v773_v18 }
  0xf6   : > { %v312_v20 = vpop.f32.mrb[5].mxu0  ;;  %776 = vmatpush3.bf16.msra.mxu0 %v773_v18  ;;  %790 = vmatpush3.bf16.msra.mxu1 %v773_v18 }
  0xf7   : > { %v777_v21 = vpack.c.bf16 %v721_v19, %v312_v20 }
  0xf9   : > { %v724_v22 = vpop.f32.mrb[6].mxu0  ;;  %778 = vmatprep.subr.bf16.mxu0 %v777_v21  ;;  %787 = vmatprep.subr.bf16.mxu1 %v777_v21 }
  0xfa   : > { %v322_v23 = vpop.f32.mrb[7].mxu0  ;;  %780 = vmatpush3.bf16.msra.mxu0 %v777_v21  ;;  %791 = vmatpush3.bf16.msra.mxu1 %v777_v21 }
  0xfb   : > { %v781_v24 = vpack.c.bf16 %v724_v22, %v322_v23 }
  0xfd   : > { %782 = vmatprep.subr.bf16.mxu0 %v781_v24  ;;  %788 = vmatprep.subr.bf16.mxu1 %v781_v24 }
  0xfe   : > { %784 = vmatpush3.bf16.msra.mxu0 %v781_v24  ;;  %792 = vmatpush3.bf16.msra.mxu1 %v781_v24 }
 0x101   : > { %751 = vmatmul.mubr.msk.f32.vlgmr.msra.gmra.mrb[0].mxu1 %vm331_vm1, %v184_v25  ;;  %742 = vmatmul.mubr.msk.f32.vlgmr.msra.gmra.mrb[8].mxu0 %vm331_vm1, %v178_v26 }
 0x102   : > { %753 = vmatprep.mubr.msk.f32.mxu1 %vm331_vm1, %v185_v27  ;;  %744 = vmatprep.mubr.msk.f32.mxu0 %vm331_vm1, %v179_v28 }
 0x105   : > { %754 = vmatmul.mubr.msk.f32.gmra.mrb[2].mxu1 %vm331_vm1, %v186_v29  ;;  %745 = vmatmul.mubr.msk.f32.gmra.mrb[10].mxu0 %vm331_vm1, %v180_v30 }
 0x106   : > { %756 = vmatprep.mubr.msk.f32.mxu1 %vm331_vm1, %v187_v31  ;;  %747 = vmatprep.mubr.msk.f32.mxu0 %vm331_vm1, %v181_v32 }
 0x109   : > { %757 = vmatmul.mubr.msk.f32.gmra.mrb[4].mxu1 %vm331_vm1, %v188_v33  ;;  %748 = vmatmul.mubr.msk.f32.gmra.mrb[12].mxu0 %vm331_vm1, %v182_v34 }
 0x10a   : > { %759 = vmatprep.mubr.msk.f32.mxu1 %vm331_vm1, %v189_v35 }
 0x10d   : > { %760 = vmatmul.mubr.msk.f32.gmra.mrb[6].mxu1 %vm331_vm1, %v190_v36 }
 0x10e   : > { %762 = vmatprep.mubr.msk.f32.mxu1 %vm331_vm1, %v191_v37 }
 0x111   : > { %763 = vmatmul.mubr.msk.f32.gmra.mrb[8].mxu1 %vm331_vm1, %v192_v38 }
 0x1d4   : > { %v752_v39 = vpop.f32.mrb[0].mxu1  ;;  %v743_v40 = vpop.f32.mrb[8].mxu0 }
 0x1d5   : > { %657 = vst.msk [vmem:[%s1054_s4 + $0x38] sm:$0xff] %vm525_vm2, %v752_v39  ;;  %v476_v41 = vpop.f32.mrb[1].mxu1  ;;  %527 = vst.msk [vmem:[%s1054_s4 + $0x8] sm:$0xff] %vm525_vm2, %v743_v40  ;;  %v446_v42 = vpop.f32.mrb[9].mxu0 }
 0x1d6   : > { %656 = vst.msk [vmem:[%s1054_s4 + $0x30] sm:$0xff] %vm525_vm2, %v476_v41  ;;  %526 = vst.msk [vmem:[%s1054_s4] sm:$0xff] %vm525_vm2, %v446_v42 }
 0x1d8   : > { %v755_v43 = vpop.f32.mrb[2].mxu1  ;;  %v746_v44 = vpop.f32.mrb[10].mxu0 }
 0x1d9   : > { %659 = vst.msk [vmem:[%s1054_s4 + $0x48] sm:$0xff] %vm525_vm2, %v755_v43  ;;  %v486_v45 = vpop.f32.mrb[3].mxu1  ;;  %529 = vst.msk [vmem:[%s1054_s4 + $0x18] sm:$0xff] %vm525_vm2, %v746_v44  ;;  %v456_v46 = vpop.f32.mrb[11].mxu0 }
 0x1da   : > { %658 = vst.msk [vmem:[%s1054_s4 + $0x40] sm:$0xff] %vm525_vm2, %v486_v45  ;;  %528 = vst.msk [vmem:[%s1054_s4 + $0x10] sm:$0xff] %vm525_vm2, %v456_v46 }
 0x1dc   : > { %v758_v47 = vpop.f32.mrb[4].mxu1  ;;  %v749_v48 = vpop.f32.mrb[12].mxu0 }
 0x1dd   : > { %661 = vst.msk [vmem:[%s1054_s4 + $0x58] sm:$0xff] %vm525_vm2, %v758_v47  ;;  %v496_v49 = vpop.f32.mrb[5].mxu1  ;;  %655 = vst.msk [vmem:[%s1054_s4 + $0x28] sm:$0xff] %vm525_vm2, %v749_v48  ;;  %v466_v50 = vpop.f32.mrb[13].mxu0 }
 0x1de   : > { %660 = vst.msk [vmem:[%s1054_s4 + $0x50] sm:$0xff] %vm525_vm2, %v496_v49  ;;  %654 = vst.msk [vmem:[%s1054_s4 + $0x20] sm:$0xff] %vm525_vm2, %v466_v50 }
 0x1e0   : > { %v761_v51 = vpop.f32.mrb[6].mxu1 }
 0x1e1   : > { %663 = vst.msk [vmem:[%s1054_s4 + $0x68] sm:$0xff] %vm525_vm2, %v761_v51  ;;  %v506_v52 = vpop.f32.mrb[7].mxu1 }
 0x1e2   : > { %662 = vst.msk [vmem:[%s1054_s4 + $0x60] sm:$0xff] %vm525_vm2, %v506_v52 }
 0x1e4   : > { %v764_v53 = vpop.f32.mrb[8].mxu1 }
 0x1e5   : > { %665 = vst.msk [vmem:[%s1054_s4 + $0x78] sm:$0xff] %vm525_vm2, %v764_v53  ;;  %v516_v54 = vpop.f32.mrb[9].mxu1 }
 0x1e6   : > { %664 = vst.msk [vmem:[%s1054_s4 + $0x70] sm:$0xff] %vm525_vm2, %v516_v54 }
 0x1e7   : > { %847 = shalt.err (!%p844_p3)
}
 0x1e8   : > { %s848_s20 = scalar_lea.hbm %s1089_s9, 2048  ;;  %s852_s26 = scalar_lea.hbm %s1143_s3, 4096 }
 0x1e9   : > { %p849_p4 = scmp.ne.s32.totalorder %s1089_s9, %s848_s20  ;;  %p853_p9 = scmp.lt.u32.totalorder %s1089_s9, %s1143_s3 }
 0x1ea   : > { %p854_p10 = scmp.lt.u32.totalorder %s852_s26, %s848_s20  ;;  %p856_p12 = scmp.lt.u32.totalorder %s848_s20, %s1089_s9 }
 0x1eb   : > { %p850_p7 = pnand %p849_p4, %p959_p5 }
 0x1ec   : > { %p855_p11 = por %p854_p10, %p853_p9 }
 0x1ed   : > { %p851_p8 = pneg %p850_p7 }
 0x1ee   : > { %p857_p13 = por %p856_p12, %p855_p11 }
 0x1f0   : > { %p858_p0 = pnand %p857_p13, %p851_p8 }
 0x1f2   : > { %861 = shalt.err (!%p858_p0)
}
 0x1f3   : > { %s899_s29 = smov 128   ;;  %s900_s30 = smov 8  }
 0x1f4   : > { %793 = dma.vmem_to_hbm [thread:$0]  (%p959_p5), %s1091_s6, 2048, %s1089_s9, %s1099_s16, %s899_s29, %s899_s29, %s900_s30  }
 0x1f5 PF: > { %p799_p1 = scmp.ge.s32.totalorder %s896_s15, 2  ;;  %s575_s4 = sand.u32 1, %s884_s12  }
 0x1f6   : > { %s576_s5 = scalar_lea.sflag [#allocation3], %s575_s4 }
 0x1f7   : > { %p796_p2 = pnand %p799_p1, %p963_p6 }
 0x1f9   : > { %879 = dma.done.wait (!%p796_p2), %s576_s5, 2048  }
 0x1fa   : > { %881 = vsyncadd (!%p796_p2), %s576_s5, 4294965248  ;;  %p13_p3 = scmp.ge.s32.totalorder %s946_s18, 4   ;;  %s1146_s12 = smov %s888_s13 }
 0x1fb   : > { %s1147_s13 = smov %s892_s14  ;;  %s1148_s14 = smov %s957_s21 }
 0x1fc   : > { %s1149_s15 = smov %s946_s18  ;;  %15 = sbr.rel (!%p13_p3) target bundleno = 3 (0x3), region = 70 }
 0x203   :  { %581 = vsyncpa [#allocation3], 1 }
 0x204   :  { %583 = vsyncpa [#allocation3 + $0x1], 1 }

</bundles_post_ra>
